<compile_context>
chip_gen: v6e
topology: v6e:2x2x1
jax: 0.10.0
libtpu: 0.0.40
codegen_flags: <defaults>
</compile_context>

<pallas_src>
import functools

import jax
import jax.numpy as jnp
from jax.experimental import pallas as pl
from jax.experimental.pallas import tpu as pltpu


def make_divisible(v, divisor, min_val=None):
    if min_val is None:
        min_val = divisor
    new_v = max(min_val, int(v + divisor / 2) // divisor * divisor)
    if new_v < 0.9 * v:
        new_v += divisor
    return new_v


# ---------------------------------------------------------------------------
# Trace-time hardware queries (Python-level; safe fallbacks if unavailable).
# ---------------------------------------------------------------------------
def _vmem_capacity_bytes():
    try:
        cap = int(getattr(pltpu.get_tpu_info(), "vmem_capacity_bytes", 0))
        if cap > 0:
            return cap
    except Exception:
        pass
    return 64 * 1024 * 1024  # conservative: v7x per-TensorCore VMEM


def _tensorcores_per_chip():
    try:
        kind = str(getattr(jax.devices()[0], "device_kind", "")).lower()
        if "v7" in kind:
            return 2
    except Exception:
        pass
    return 1


# ---------------------------------------------------------------------------
# Tiling helpers.
# ---------------------------------------------------------------------------
def _choose_block_batch(n, per_sample_bytes, target_bytes, min_steps):
    """Largest divisor nb of n with nb*per_sample <= target and n//nb >= min_steps.

    nb=1 is always the fallback (caller decides whether a too-big single sample
    needs the two-phase / HW-blocked path instead)."""
    best = 1
    for nb in range(2, n + 1):
        if n % nb:
            continue
        if nb * per_sample_bytes > target_bytes:
            break
        if n // nb < min_steps:
            break
        best = nb
    return best


def _choose_hw_block(hw_pad, bytes_per_hw_col, target_bytes, min_blocks=1):
    """Largest multiple-of-128 divisor of hw_pad whose block fits target_bytes
    while leaving at least min_blocks grid steps. Falls back to 128."""
    best = 128
    for blk in range(128, hw_pad + 1, 128):
        if hw_pad % blk:
            continue
        if blk * bytes_per_hw_col > target_bytes:
            continue
        if hw_pad // blk < min_blocks:
            continue
        best = blk
    return best


# ---------------------------------------------------------------------------
# Kernels.
# ---------------------------------------------------------------------------
def _se_kernel(x_ref, w1_ref, b1_ref, w2_ref, b2_ref, o_ref, *, inv_hw):
    """Single-pass SE: pool + 1x1 reduce + ReLU + 1x1 expand + h-sigmoid + rescale."""
    x = x_ref[...]                                             # (nb, C, HWp), input dtype
    # Global average pool over spatial axis, accumulated in f32 (zero padding is
    # harmless because inv_hw uses the true HW).
    m = jnp.sum(x, axis=-1, dtype=jnp.float32) * inv_hw        # (nb, C)
    # 1x1 "reduce" conv + ReLU as a batched MXU matmul.
    y1 = jnp.dot(m, w1_ref[...], preferred_element_type=jnp.float32) + b1_ref[...]
    y1 = jnp.maximum(y1, 0.0)                                  # (nb, num_mid)
    # 1x1 "expand" conv + h-sigmoid: relu6(y + 3) / 6.
    y2 = jnp.dot(y1, w2_ref[...], preferred_element_type=jnp.float32) + b2_ref[...]
    scale = jnp.clip(y2 + 3.0, 0.0, 6.0) * (1.0 / 6.0)         # (nb, C) f32
    # Channel-wise rescale in the input dtype (no full-tile f32 copy).
    o_ref[...] = (x * scale.astype(x.dtype)[:, :, None]).astype(o_ref.dtype)


def _se_pool_kernel(x_ref, w1_ref, b1_ref, w2_ref, b2_ref, s_ref, acc_ref, *, inv_hw):
    """Phase 1: pooled mean accumulated over HW blocks, then FC + h-sigmoid -> scale."""
    h = pl.program_id(1)

    @pl.when(h == 0)
    def _():
        acc_ref[...] = jnp.zeros_like(acc_ref)

    acc_ref[...] += jnp.sum(x_ref[...], axis=-1, dtype=jnp.float32)   # (1, C)

    @pl.when(h == pl.num_programs(1) - 1)
    def _():
        m = acc_ref[...] * inv_hw                                     # (1, C) f32
        y1 = jnp.dot(m, w1_ref[...], preferred_element_type=jnp.float32) + b1_ref[...]
        y1 = jnp.maximum(y1, 0.0)
        y2 = jnp.dot(y1, w2_ref[...], preferred_element_type=jnp.float32) + b2_ref[...]
        s = jnp.clip(y2 + 3.0, 0.0, 6.0) * (1.0 / 6.0)                # (1, C)
        s_ref[...] = s[:, :, None]                                    # (1, C, 1)


def _se_rescale_kernel(x_ref, s_ref, o_ref):
    """Phase 2: channel-wise rescale, blocked over (batch, HW); both axes parallel."""
    x = x_ref[...]                                             # (1, C, hw_blk)
    o_ref[...] = (x * s_ref[...].astype(x.dtype)).astype(o_ref.dtype)


# ---------------------------------------------------------------------------
# Wrapper.
# ---------------------------------------------------------------------------
@functools.partial(jax.jit, static_argnames=("force_two_phase",))
def se_module(x, w_reduce, b_reduce, w_expand, b_expand, *, force_two_phase=False):
    """x: (N, C, H, W); PyTorch Conv2d(1x1) weights squeezed to 2D:
       w_reduce (num_mid, C), b_reduce (num_mid,), w_expand (C, num_mid), b_expand (C,)."""
    N, C, H, W = x.shape
    HW = H * W
    num_mid = w_reduce.shape[0]
    inv_hw = 1.0 / float(HW)

    # Lane-dense spatial axis: pad HW to a multiple of 128 (zero pad is exact for the
    # pool since we divide by the true HW; padded columns are sliced off at the end).
    HW_pad = -(-HW // 128) * 128
    xr = x.reshape(N, C, HW)
    if HW_pad != HW:
        xr = jnp.pad(xr, ((0, 0), (0, 0), (0, HW_pad - HW)))

    itemsize = jnp.dtype(x.dtype).itemsize
    per_sample = C * HW_pad * itemsize

    # Tiny resident weights; kept f32 (matmul LHS is the f32 pooled mean).
    w1t = w_reduce.astype(jnp.float32).T            # (C, num_mid)
    w2t = w_expand.astype(jnp.float32).T            # (num_mid, C)
    b1 = b_reduce.astype(jnp.float32).reshape(1, num_mid)
    b2 = b_expand.astype(jnp.float32).reshape(1, C)
    weight_bytes = 4 * (w1t.size + w2t.size + b1.size + b2.size)

    # Generation-aware budget: ~70% of physical VMEM (64 MiB fallback covers v7x),
    # then a large tile target (8-16 MiB class) so fixed per-step overhead is <7%.
    vmem_cap = _vmem_capacity_bytes()
    num_tc = _tensorcores_per_chip()
    budget = int(vmem_cap * 0.70)
    margin = 2 * 1024 * 1024
    target_tile = min(max((budget - 4 * weight_bytes - margin) // 4, 1024 * 1024),
                      16 * 1024 * 1024)

    # Single-TC chips: prefer hitting the tile target (grid may be 1).
    # 2-TC chips (v7x): require >= 2 steps per TensorCore from the batch grid.
    min_steps = 1 if num_tc == 1 else 2 * num_tc
    nb = _choose_block_batch(N, per_sample, target_tile, min_steps)
    grid_n = N // nb

    sample_too_big = per_sample > target_tile
    use_two_phase = (force_two_phase or sample_too_big
                     or (num_tc > 1 and grid_n < 2 * num_tc))

    if not use_two_phase:
        block_bytes = nb * per_sample
        vmem_bytes = int(max(4 * block_bytes + 4 * weight_bytes + margin,
                             16 * 1024 * 1024))
        out = pl.pallas_call(
            functools.partial(_se_kernel, inv_hw=inv_hw),
            out_shape=jax.ShapeDtypeStruct((N, C, HW_pad), x.dtype),
            grid_spec=pltpu.PrefetchScalarGridSpec(
                num_scalar_prefetch=0,
                grid=(grid_n,),
                in_specs=[
                    pl.BlockSpec((nb, C, HW_pad), lambda n: (n, 0, 0)),
                    pl.BlockSpec((C, num_mid), lambda n: (0, 0)),
                    pl.BlockSpec((1, num_mid), lambda n: (0, 0)),
                    pl.BlockSpec((num_mid, C), lambda n: (0, 0)),
                    pl.BlockSpec((1, C), lambda n: (0, 0)),
                ],
                out_specs=pl.BlockSpec((nb, C, HW_pad), lambda n: (n, 0, 0)),
            ),
            compiler_params=pltpu.CompilerParams(
                dimension_semantics=("parallel",),
                vmem_limit_bytes=vmem_bytes,
            ),
        )(xr, w1t, b1, w2t, b2)
    else:
        # ---- Phase 1: pool (accumulated over HW blocks) + FC -> scale (N, C, 1) ----
        hw_blk1 = _choose_hw_block(HW_pad, C * itemsize, target_tile)
        vmem1 = int(max(4 * C * hw_blk1 * itemsize + 4 * weight_bytes + margin,
                        16 * 1024 * 1024))
        scale = pl.pallas_call(
            functools.partial(_se_pool_kernel, inv_hw=inv_hw),
            out_shape=jax.ShapeDtypeStruct((N, C, 1), jnp.float32),
            grid_spec=pltpu.PrefetchScalarGridSpec(
                num_scalar_prefetch=0,
                grid=(N, HW_pad // hw_blk1),
                in_specs=[
                    pl.BlockSpec((1, C, hw_blk1), lambda n, h: (n, 0, h)),
                    pl.BlockSpec((C, num_mid), lambda n, h: (0, 0)),
                    pl.BlockSpec((1, num_mid), lambda n, h: (0, 0)),
                    pl.BlockSpec((num_mid, C), lambda n, h: (0, 0)),
                    pl.BlockSpec((1, C), lambda n, h: (0, 0)),
                ],
                out_specs=pl.BlockSpec((1, C, 1), lambda n, h: (n, 0, 0)),
                scratch_shapes=[pltpu.VMEM((1, C), jnp.float32)],
            ),
            compiler_params=pltpu.CompilerParams(
                dimension_semantics=("parallel", "arbitrary"),
                vmem_limit_bytes=vmem1,
            ),
        )(xr, w1t, b1, w2t, b2)

        # ---- Phase 2: rescale, blocked over (batch, HW); both parallel so small-N
        # inference shapes still feed both v7x TensorCores. ----
        min_hw_blocks = max(1, -(-2 * num_tc // max(N, 1)))
        hw_blk2 = _choose_hw_block(HW_pad, C * itemsize, target_tile, min_hw_blocks)
        vmem2 = int(max(4 * C * hw_blk2 * itemsize + margin, 16 * 1024 * 1024))
        out = pl.pallas_call(
            _se_rescale_kernel,
            out_shape=jax.ShapeDtypeStruct((N, C, HW_pad), x.dtype),
            grid_spec=pltpu.PrefetchScalarGridSpec(
                num_scalar_prefetch=0,
                grid=(N, HW_pad // hw_blk2),
                in_specs=[
                    pl.BlockSpec((1, C, hw_blk2), lambda n, h: (n, 0, h)),
                    pl.BlockSpec((1, C, 1), lambda n, h: (n, 0, 0)),
                ],
                out_specs=pl.BlockSpec((1, C, hw_blk2), lambda n, h: (n, 0, h)),
            ),
            compiler_params=pltpu.CompilerParams(
                dimension_semantics=("parallel", "parallel"),
                vmem_limit_bytes=vmem2,
            ),
        )(xr, scale)

    if HW_pad != HW:
        out = out[:, :, :HW]
    return out.reshape(N, C, H, W)


def se_module_ref(x, w_reduce, b_reduce, w_expand, b_expand):
    """Pure-JAX reference mirroring the PyTorch forward."""
    y = x.mean(axis=3, keepdims=True).mean(axis=2, keepdims=True)    # (N, C, 1, 1)
    y = jnp.einsum('nchw,mc->nmhw', y, w_reduce) + b_reduce[None, :, None, None]
    y = jax.nn.relu(y)
    y = jnp.einsum('nmhw,cm->nchw', y, w_expand) + b_expand[None, :, None, None]
    y = jnp.clip(y + 3.0, 0.0, 6.0) / 6.0
    return x * y


if __name__ == "__main__":
    # SEModule(channel=32): num_mid = make_divisible(32 // 4, 8) = 8
    N, C, H, W = 2, 32, 16, 16
    num_mid = make_divisible(C // 4, divisor=8)

    key = jax.random.PRNGKey(0)
    k_x, k_w1, k_b1, k_w2, k_b2, k_x2 = jax.random.split(key, 6)

    x = jax.random.normal(k_x, (N, C, H, W), dtype=jnp.float32)
    # PyTorch Conv2d 1x1 weights are (out, in, 1, 1); stored squeezed to (out, in).
    w_reduce = jax.random.normal(k_w1, (num_mid, C), dtype=jnp.float32) * 0.1
    b_reduce = jax.random.normal(k_b1, (num_mid,), dtype=jnp.float32) * 0.1
    w_expand = jax.random.normal(k_w2, (C, num_mid), dtype=jnp.float32) * 0.1
    b_expand = jax.random.normal(k_b2, (C,), dtype=jnp.float32) * 0.1

    ref = se_module_ref(x, w_reduce, b_reduce, w_expand, b_expand)

    # Default path (single-pass fused kernel on single-TC chips).
    out = jax.block_until_ready(se_module(x, w_reduce, b_reduce, w_expand, b_expand))
    assert out.shape == (N, C, H, W)
    assert jnp.allclose(out, ref, atol=1e-5, rtol=1e-5), "single-pass mismatch vs reference"

    # Two-phase path (pool pass + HW-blocked rescale pass), used for small-N on v7x
    # and for oversized per-sample slabs; exercised here explicitly for correctness.
    out2 = jax.block_until_ready(
        se_module(x, w_reduce, b_reduce, w_expand, b_expand, force_two_phase=True))
    assert jnp.allclose(out2, ref, atol=1e-5, rtol=1e-5), "two-phase mismatch vs reference"

    # Non-multiple-of-128 spatial size (14x14) exercises the lane-padding path.
    x3 = jax.random.normal(k_x2, (N, C, 14, 14), dtype=jnp.float32)
    ref3 = se_module_ref(x3, w_reduce, b_reduce, w_expand, b_expand)
    out3 = jax.block_until_ready(se_module(x3, w_reduce, b_reduce, w_expand, b_expand))
    assert jnp.allclose(out3, ref3, atol=1e-5, rtol=1e-5), "padded-HW mismatch vs reference"

    print("KERNEL_OK")
</pallas_src>

<mosaic_0001>
module attributes {stable_mosaic.version = 11 : i64} {
  func.func @_se_kernel(%arg0: i32, %arg1: memref<2x32x256xf32, #tpu.memory_space<vmem>>, %arg2: memref<32x8xf32, #tpu.memory_space<vmem>>, %arg3: memref<1x8xf32, #tpu.memory_space<vmem>>, %arg4: memref<8x32xf32, #tpu.memory_space<vmem>>, %arg5: memref<1x32xf32, #tpu.memory_space<vmem>>, %arg6: memref<2x32x256xf32, #tpu.memory_space<vmem>>) attributes {dimension_semantics = [#tpu.dimension_semantics<parallel>], iteration_bounds = array<i64: 1>, scalar_prefetch = 0 : i64, scratch_operands = 0 : i64, tpu.core_type = #tpu.core_type<tc>, window_params = [{transform_indices = @transform_0, window_bounds = array<i64: 2, 32, 256>}, {pipeline_mode = #tpu.pipeline_mode<synchronous>, transform_indices = @transform_1, window_bounds = array<i64: 32, 8>}, {pipeline_mode = #tpu.pipeline_mode<synchronous>, transform_indices = @transform_2, window_bounds = array<i64: 1, 8>}, {pipeline_mode = #tpu.pipeline_mode<synchronous>, transform_indices = @transform_3, window_bounds = array<i64: 8, 32>}, {pipeline_mode = #tpu.pipeline_mode<synchronous>, transform_indices = @transform_4, window_bounds = array<i64: 1, 32>}, {transform_indices = @transform_5, window_bounds = array<i64: 2, 32, 256>}]} {
    %c0 = arith.constant 0 : index
    %c0_0 = arith.constant 0 : index
    %c0_1 = arith.constant 0 : index
    %0 = vector.load %arg1[%c0, %c0_0, %c0_1] : memref<2x32x256xf32, #tpu.memory_space<vmem>>, vector<2x32x256xf32>
    %cst = arith.constant dense<0.000000e+00> : vector<2x32xf32>
    %1 = vector.multi_reduction <add>, %0, %cst [2] : vector<2x32x256xf32> to vector<2x32xf32>
    %cst_2 = arith.constant 3.906250e-03 : f32
    %2 = vector.broadcast %cst_2 : f32 to vector<2x32xf32>
    %3 = arith.mulf %1, %2 : vector<2x32xf32>
    %c0_3 = arith.constant 0 : index
    %c0_4 = arith.constant 0 : index
    %4 = vector.load %arg2[%c0_3, %c0_4] : memref<32x8xf32, #tpu.memory_space<vmem>>, vector<32x8xf32>
    %cst_5 = arith.constant dense<0.000000e+00> : vector<2x8xf32>
    %5 = tpu.matmul %3, %4, %cst_5 {dimension_numbers = #tpu.dot_dimension_numbers<[1], [0], [0], [1], [0, 0, 1, 1], [], []>} : vector<2x32xf32>, vector<32x8xf32>, vector<2x8xf32> -> vector<2x8xf32>
    %c0_6 = arith.constant 0 : index
    %c0_7 = arith.constant 0 : index
    %6 = vector.load %arg3[%c0_6, %c0_7] : memref<1x8xf32, #tpu.memory_space<vmem>>, vector<1x8xf32>
    %7 = vector.broadcast %6 : vector<1x8xf32> to vector<2x8xf32>
    %8 = arith.addf %5, %7 : vector<2x8xf32>
    %cst_8 = arith.constant 0.000000e+00 : f32
    %9 = vector.broadcast %cst_8 : f32 to vector<2x8xf32>
    %10 = arith.maximumf %8, %9 : vector<2x8xf32>
    %c0_9 = arith.constant 0 : index
    %c0_10 = arith.constant 0 : index
    %11 = vector.load %arg4[%c0_9, %c0_10] : memref<8x32xf32, #tpu.memory_space<vmem>>, vector<8x32xf32>
    %cst_11 = arith.constant dense<0.000000e+00> : vector<2x32xf32>
    %12 = tpu.matmul %10, %11, %cst_11 {dimension_numbers = #tpu.dot_dimension_numbers<[1], [0], [0], [1], [0, 0, 1, 1], [], []>} : vector<2x8xf32>, vector<8x32xf32>, vector<2x32xf32> -> vector<2x32xf32>
    %c0_12 = arith.constant 0 : index
    %c0_13 = arith.constant 0 : index
    %13 = vector.load %arg5[%c0_12, %c0_13] : memref<1x32xf32, #tpu.memory_space<vmem>>, vector<1x32xf32>
    %14 = vector.broadcast %13 : vector<1x32xf32> to vector<2x32xf32>
    %15 = arith.addf %12, %14 : vector<2x32xf32>
    %cst_14 = arith.constant 3.000000e+00 : f32
    %16 = vector.broadcast %cst_14 : f32 to vector<2x32xf32>
    %17 = arith.addf %15, %16 : vector<2x32xf32>
    %cst_15 = arith.constant 0.000000e+00 : f32
    %cst_16 = arith.constant 6.000000e+00 : f32
    %18 = vector.broadcast %cst_15 : f32 to vector<2x32xf32>
    %19 = arith.maximumf %18, %17 : vector<2x32xf32>
    %20 = vector.broadcast %cst_16 : f32 to vector<2x32xf32>
    %21 = arith.minimumf %20, %19 : vector<2x32xf32>
    %cst_17 = arith.constant 0.166666672 : f32
    %22 = vector.broadcast %cst_17 : f32 to vector<2x32xf32>
    %23 = arith.mulf %21, %22 : vector<2x32xf32>
    %24 = vector.shape_cast %23 : vector<2x32xf32> to vector<2x32x1xf32>
    %25 = vector.broadcast %24 : vector<2x32x1xf32> to vector<2x32x256xf32>
    %26 = arith.mulf %0, %25 : vector<2x32x256xf32>
    %c0_18 = arith.constant 0 : index
    %c0_19 = arith.constant 0 : index
    %c0_20 = arith.constant 0 : index
    %27 = vector.load %arg6[%c0_18, %c0_19, %c0_20] : memref<2x32x256xf32, #tpu.memory_space<vmem>>, vector<2x32x256xf32>
    tpu.vector_store %arg6[%c0_18, %c0_19, %c0_20], %26 {strides = array<i32>} : memref<2x32x256xf32, #tpu.memory_space<vmem>>, vector<2x32x256xf32>,
    return
  }
  func.func @transform_0(%arg0: i32) -> (i32, i32, i32) {
    %c0_i32 = arith.constant 0 : i32
    %c0_i32_0 = arith.constant 0 : i32
    %c0_i32_1 = arith.constant 0 : i32
    return %arg0, %c0_i32, %c0_i32_0 : i32, i32, i32
  }
  func.func @transform_1(%arg0: i32) -> (i32, i32) {
    %c0_i32 = arith.constant 0 : i32
    %c0_i32_0 = arith.constant 0 : i32
    %c0_i32_1 = arith.constant 0 : i32
    return %c0_i32, %c0_i32_0 : i32, i32
  }
  func.func @transform_2(%arg0: i32) -> (i32, i32) {
    %c0_i32 = arith.constant 0 : i32
    %c0_i32_0 = arith.constant 0 : i32
    %c0_i32_1 = arith.constant 0 : i32
    return %c0_i32, %c0_i32_0 : i32, i32
  }
  func.func @transform_3(%arg0: i32) -> (i32, i32) {
    %c0_i32 = arith.constant 0 : i32
    %c0_i32_0 = arith.constant 0 : i32
    %c0_i32_1 = arith.constant 0 : i32
    return %c0_i32, %c0_i32_0 : i32, i32
  }
  func.func @transform_4(%arg0: i32) -> (i32, i32) {
    %c0_i32 = arith.constant 0 : i32
    %c0_i32_0 = arith.constant 0 : i32
    %c0_i32_1 = arith.constant 0 : i32
    return %c0_i32, %c0_i32_0 : i32, i32
  }
  func.func @transform_5(%arg0: i32) -> (i32, i32, i32) {
    %c0_i32 = arith.constant 0 : i32
    %c0_i32_0 = arith.constant 0 : i32
    %c0_i32_1 = arith.constant 0 : i32
    return %arg0, %c0_i32, %c0_i32_0 : i32, i32, i32
  }
}

</mosaic_0001>

<bundles_post_ra>
// kernel: se_module.1
= control target key start
LH: loop header
LB: loop body
LE: loop exit
PB: predicated region body
PF: predicated region fallthrough
CT: control target
= control target key end

     0   :  { %v398_v24 = vmov 0.0   ;;  %vm399_vm0 = vmmov 0   ;;  %v87_v29 = vlaneseq  ;;  %vm98_vm1 = vcmask 130112   ;;  %s619_s0 = inlined_call_operand.vmem [shape: f32[2,32,256], index: 0, kind: input, shape index: {}]   ;;  %s620_s1 = inlined_call_operand.vmem [shape: f32[32,8], index: 1, kind: input, shape index: {}]   ;;  %s621_s3 = inlined_call_operand.vmem [shape: f32[8,32], index: 3, kind: input, shape index: {}]   ;;  %s622_s2 = inlined_call_operand.vmem [shape: f32[1,8], index: 2, kind: input, shape index: {}]   ;;  %s623_s4 = inlined_call_operand.vmem [shape: f32[1,32], index: 4, kind: input, shape index: {}]   ;;  %s624_s5 = inlined_call_operand.vmem [shape: f32[2,32,256], index: 5, kind: output, shape index: {}]  }
   0x1   :  { %v433_v0 = vld [vmem:[%s619_s0 + $0x40] sm:$0xff]  ;;  %v438_v1 = vld [vmem:[%s619_s0 + $0x48] sm:$0xff]  ;;  %v455_v5 = vld [vmem:[%s619_s0 + $0x50] sm:$0xff]  ;;  %380 = vmatprep.subr.mxu0 %v398_v24  ;;  %391 = vmatprep.subr.mxu1 %v398_v24  ;;  %vm105_vm2 = vcmask 195712   ;;  %vm112_vm3 = vcmask 261312   ;;  %vm133_vm4 = vcmask 1041409  }
   0x2   :  { %v443_v2 = vld [vmem:[%s619_s0] sm:$0xff]  ;;  %v48_v3 = vadd.f32 %v438_v1, %v433_v0  ;;  %v450_v4 = vld [vmem:[%s619_s0 + $0x8] sm:$0xff]  ;;  %v460_v6 = vld [vmem:[%s619_s0 + $0x58] sm:$0xff]  ;;  %388 = vmatprep.mubr.msk.f32.mxu0 %vm399_vm0, %v398_v24  ;;  %393 = vmatprep.mubr.msk.f32.mxu1 %vm399_vm0, %v398_v24  ;;  %v88_v31 = vand.u32 127, %v87_v29  ;;  %v538_v36 = vshrl.u32 %v87_v29, 7  ;;  %vm135_vm5 = vcmask 261120  }
   0x3   :  { %v36_v7 = vadd.f32 %v450_v4, %v443_v2  ;;  %v467_v8 = vld [vmem:[%s619_s0 + $0x10] sm:$0xff]  ;;  %v472_v9 = vld [vmem:[%s619_s0 + $0x18] sm:$0xff]  ;;  %v51_v10 = vadd.f32 %v460_v6, %v455_v5  ;;  %v481_v12 = vld [vmem:[%s619_s0 + $0x60] sm:$0xff]  ;;  %vm217_vm6 = vcmask 64512  }
   0x4   :  { %49 = vadd.xlane.f32.xlu1 %v48_v3  ;;  %v39_v11 = vadd.f32 %v472_v9, %v467_v8  ;;  %v486_v13 = vld [vmem:[%s619_s0 + $0x68] sm:$0xff]  ;;  %v491_v14 = vld [vmem:[%s619_s0 + $0x20] sm:$0xff]  ;;  %v505_v18 = vld [vmem:[%s619_s0 + $0x70] sm:$0xff]  ;;  %v93_v33 = vadd.s32 4294967288, %v88_v31  ;;  %v100_v35 = vadd.s32 4294967280, %v88_v31  ;;  %v107_v40 = vadd.s32 4294967272, %v88_v31 }
   0x5   :  { %37 = vadd.xlane.f32.xlu0 %v36_v7  ;;  %v496_v15 = vld [vmem:[%s619_s0 + $0x28] sm:$0xff]  ;;  %v54_v16 = vadd.f32 %v486_v13, %v481_v12  ;;  %v510_v19 = vld [vmem:[%s619_s0 + $0x78] sm:$0xff]  ;;  %v515_v20 = vld [vmem:[%s619_s0 + $0x30] sm:$0xff]  ;;  %v91_v44 = vsub.s32 %v88_v31, %v538_v36 }
   0x6   :  { %v42_v17 = vadd.f32 %v496_v15, %v491_v14  ;;  %v520_v21 = vld [vmem:[%s619_s0 + $0x38] sm:$0xff]  ;;  %v57_v22 = vadd.f32 %v510_v19, %v505_v18  ;;  %v70_v26 = vld [vmem:[%s620_s1 + $0x10] sm:$0xff]  ;;  %v69_v27 = vld [vmem:[%s620_s1 + $0x8] sm:$0xff]  ;;  %v96_v38 = vsub.s32 %v93_v33, %v538_v36  ;;  %v103_v42 = vsub.s32 %v100_v35, %v538_v36 }
   0x7   :  { %v45_v23 = vadd.f32 %v520_v21, %v515_v20  ;;  %v71_v25 = vld [vmem:[%s620_s1 + $0x18] sm:$0xff]  ;;  %v68_v28 = vld [vmem:[%s620_s1] sm:$0xff]  ;;  %v110_v51 = vsub.s32 %v107_v40, %v538_v36  ;;  %v297_v35 = vsub.s32 0, %v538_v36 }
   0x8   :  { %52 = vadd.xlane.f32.xlu1 %v51_v10  ;;  %381 = vmatpush3.msra.mxu0 %v71_v25 }
   0x9   :  { %40 = vadd.xlane.f32.xlu0 %v39_v11  ;;  %382 = vmatprep.subr.mxu0 %v398_v24 }
   0xa   :  { %383 = vmatpush3.msra.mxu0 %v70_v26 }
   0xb   :  { %384 = vmatprep.subr.mxu0 %v398_v24 }
   0xc   :  { %55 = vadd.xlane.f32.xlu1 %v54_v16  ;;  %385 = vmatpush3.msra.mxu0 %v69_v27 }
   0xd   :  { %43 = vadd.xlane.f32.xlu0 %v42_v17  ;;  %386 = vmatprep.subr.mxu0 %v398_v24 }
   0xe   :  { %387 = vmatpush3.msra.mxu0 %v68_v28  ;;  %v371_v28 = vld [vmem:[%s623_s4] ss:$0 sm:$0xff] }
  0x10   :  { %58 = vadd.xlane.f32.xlu1 %v57_v22  ;;  %v209_v22 = vld [vmem:[%s621_s3] sm:$0xff] }
  0x11   :  { %46 = vadd.xlane.f32.xlu0 %v45_v23  ;;  %392 = vmatpush3.msra.mxu1 %v209_v22  ;;  %v369_v23 = vld [vmem:[%s622_s2] ss:$0 sm:$0xff] }
  0x8d   :  { %v50_v30 = vpop.xlane.xlu1 %49 }
  0x8e   :  { %v38_v32 = vpop.xlane.xlu0 %37  ;;  %v64_v45 = vmul.f32 0.00390625, %v50_v30 }
  0x8f   :  { %v60_v48 = vmul.f32 0.00390625, %v38_v32 }
  0x90   :  { %v117_v55 = vrot.slane %v64_v45, %v91_v44 }
  0x91   :  { %v53_v34 = vpop.xlane.xlu1 %52  ;;  %v92_v59 = vrot.slane %v60_v48, %v91_v44 }
  0x92   :  { %v41_v37 = vpop.xlane.xlu0 %40  ;;  %v65_v39 = vmul.f32 0.00390625, %v53_v34 }
  0x93   :  { %v61_v41 = vmul.f32 0.00390625, %v41_v37 }
  0x94   :  { %v121_v50 = vrot.slane %v65_v39, %v96_v38  ;;  %v316_v39 = vsub.s32 1, %v538_v36 }
  0x95   :  { %v56_v43 = vpop.xlane.xlu1 %55  ;;  %v97_v52 = vrot.slane %v61_v41, %v96_v38 }
  0x96   :  { %v66_v46 = vmul.f32 0.00390625, %v56_v43  ;;  %v44_v47 = vpop.xlane.xlu0 %43  ;;  %v122_v61 = vsel %vm98_vm1, %v121_v50, %v117_v55 }
  0x97   :  { %v62_v49 = vmul.f32 0.00390625, %v44_v47  ;;  %v99_v63 = vsel %vm98_vm1, %v97_v52, %v92_v59 }
  0x98   :  { %v126_v53 = vrot.slane %v66_v46, %v103_v42 }
  0x99   :  { %v59_v54 = vpop.xlane.xlu1 %58  ;;  %v104_v56 = vrot.slane %v62_v49, %v103_v42 }
  0x9a   :  { %v67_v57 = vmul.f32 0.00390625, %v59_v54  ;;  %v47_v58 = vpop.xlane.xlu0 %46  ;;  %v127_v3 = vsel %vm105_vm2, %v126_v53, %v122_v61 }
  0x9b   :  { %v63_v60 = vmul.f32 0.00390625, %v47_v58  ;;  %v106_v10 = vsel %vm105_vm2, %v104_v56, %v99_v63 }
  0x9c   :  { %v131_v62 = vrot.slane %v67_v57, %v110_v51 }
  0x9d   :  { %v111_v7 = vrot.slane %v63_v60, %v110_v51 }
  0x9e   :  { %v132_v11 = vsel %vm112_vm3, %v131_v62, %v127_v3 }
  0x9f   :  { %v113_v16 = vsel %vm112_vm3, %v111_v7, %v106_v10 }
  0xa0   :  { %v134_v17 = vsel %vm133_vm4, %v132_v11, %v113_v16 }
  0xa1   :  { %389 = vmatmul.mubr.msk.f32.vlgmr.msra.gmra.mxu0 %vm135_vm5, %v134_v17 }
 0x161   :  { %v204_v24 = vpop.f32.mrf.mxu0 }
 0x162   :  { %v205_v25 = vadd.f32 %v369_v23, %v204_v24 }
 0x163   :  { %v390_v26 = vpop.f32.mrf.mxu0 }
 0x164   :  { %v208_v27 = vmax.f32 %v205_v25, 0.0 }
 0x166   :  { %394 = vmatmul.mubr.msk.f32.vlgmr.msra.gmra.mxu1 %vm217_vm6, %v208_v27 }
 0x226   :  { %v287_v29 = vpop.f32.mrf.mxu1 }
 0x227   :  { %v288_v30 = vadd.f32 %v371_v28, %v287_v29 }
 0x228   :  { %v395_v31 = vpop.f32.mrf.mxu1 }
 0x229   :  { %v291_v32 = vadd.f32 3.0, %v288_v30 }
 0x22b   :  { %v292_v33 = vmax.f32 %v291_v32, 0.0 }
 0x22d   :  { %v293_v34 = vmin.f32 %v292_v33, 6.0 }
 0x22f   :  { %v294_v37 = vmul.f32 0.16666667, %v293_v34 }
 0x231   :  { %v298_v38 = vrot.slane %v294_v37, %v297_v35  ;;  %v317_v40 = vrot.slane %v294_v37, %v316_v39 }
 0x233   :  { %304 = vbcast.lane.b32.xlu1 %v298_v38, 264  ;;  %300 = vbcast.lane.b32.xlu0 %v298_v38, 256 }
 0x237   :  { %308 = vbcast.lane.b32.xlu1 %v298_v38, 272  ;;  %319 = vbcast.lane.b32.xlu0 %v317_v40, 256 }
 0x23b   :  { %312 = vbcast.lane.b32.xlu1 %v298_v38, 280  ;;  %327 = vbcast.lane.b32.xlu0 %v317_v40, 272 }
 0x23f   :  { %323 = vbcast.lane.b32.xlu1 %v317_v40, 264 }
 0x243   :  { %331 = vbcast.lane.b32.xlu1 %v317_v40, 280 }
 0x2a5   :  { %v305_v41 = vpop.permute.xlu1 %304  ;;  %v301_v42 = vpop.permute.xlu0 %300 }
 0x2a6   :  { %v335_v43 = vmul.f32 %v305_v41, %v467_v8  ;;  %v336_v44 = vmul.f32 %v305_v41, %v472_v9  ;;  %v333_v45 = vmul.f32 %v301_v42, %v443_v2  ;;  %v334_v46 = vmul.f32 %v301_v42, %v450_v4 }
 0x2a8   :  { %351 = vst [vmem:[%s624_s5 + $0x10] sm:$0xff] %v335_v43  ;;  %352 = vst [vmem:[%s624_s5 + $0x18] sm:$0xff] %v336_v44 }
 0x2a9   :  { %349 = vst [vmem:[%s624_s5] sm:$0xff] %v333_v45  ;;  %350 = vst [vmem:[%s624_s5 + $0x8] sm:$0xff] %v334_v46  ;;  %v309_v8 = vpop.permute.xlu1 %308  ;;  %v320_v2 = vpop.permute.xlu0 %319 }
 0x2aa   :  { %v337_v4 = vmul.f32 %v309_v8, %v491_v14  ;;  %v338_v9 = vmul.f32 %v309_v8, %v496_v15  ;;  %v341_v36 = vmul.f32 %v320_v2, %v433_v0  ;;  %v342_v47 = vmul.f32 %v320_v2, %v438_v1 }
 0x2ac   :  { %353 = vst [vmem:[%s624_s5 + $0x20] sm:$0xff] %v337_v4  ;;  %354 = vst [vmem:[%s624_s5 + $0x28] sm:$0xff] %v338_v9 }
 0x2ad   :  { %357 = vst [vmem:[%s624_s5 + $0x40] sm:$0xff] %v341_v36  ;;  %358 = vst [vmem:[%s624_s5 + $0x48] sm:$0xff] %v342_v47  ;;  %v313_v14 = vpop.permute.xlu1 %312  ;;  %v328_v0 = vpop.permute.xlu0 %327 }
 0x2ae   :  { %v339_v1 = vmul.f32 %v313_v14, %v515_v20  ;;  %v340_v15 = vmul.f32 %v313_v14, %v520_v21  ;;  %v345_v48 = vmul.f32 %v328_v0, %v481_v12  ;;  %v346_v49 = vmul.f32 %v328_v0, %v486_v13 }
 0x2b0   :  { %355 = vst [vmem:[%s624_s5 + $0x30] sm:$0xff] %v339_v1  ;;  %356 = vst [vmem:[%s624_s5 + $0x38] sm:$0xff] %v340_v15 }
 0x2b1   :  { %361 = vst [vmem:[%s624_s5 + $0x60] sm:$0xff] %v345_v48  ;;  %362 = vst [vmem:[%s624_s5 + $0x68] sm:$0xff] %v346_v49  ;;  %v324_v20 = vpop.permute.xlu1 %323 }
 0x2b2   :  { %v343_v12 = vmul.f32 %v324_v20, %v455_v5  ;;  %v344_v13 = vmul.f32 %v324_v20, %v460_v6 }
 0x2b4   :  { %359 = vst [vmem:[%s624_s5 + $0x50] sm:$0xff] %v343_v12  ;;  %360 = vst [vmem:[%s624_s5 + $0x58] sm:$0xff] %v344_v13 }
 0x2b5   :  { %v332_v21 = vpop.permute.xlu1 %331 }
 0x2b6   :  { %v347_v50 = vmul.f32 %v332_v21, %v505_v18  ;;  %v348_v51 = vmul.f32 %v332_v21, %v510_v19 }
 0x2b8   :  { %363 = vst [vmem:[%s624_s5 + $0x70] sm:$0xff] %v347_v50  ;;  %364 = vst [vmem:[%s624_s5 + $0x78] sm:$0xff] %v348_v51 }

</bundles_post_ra>
